<compile_context>
chip_gen: v7x
topology: tpu7x:2x2x1
jax: 0.10.0
libtpu: 0.0.40
codegen_flags: <defaults>
</compile_context>

<pallas_src>
import math

import jax
import jax.numpy as jnp
from jax.experimental import pallas as pl
from jax.experimental.pallas import tpu as pltpu


def _cdiv(a, b):
    return -(-a // b)


def _round_up(a, b):
    return _cdiv(a, b) * b


def _scalar_kernel(x_ref, mean_ref, inv_std_ref, o_ref):
    # x_ref: (tile_m, W); mean_ref / inv_std_ref: (1, W) broadcast over rows.
    o_ref[...] = (x_ref[...] - mean_ref[...]) * inv_std_ref[...]


def scalar_forward(x, scalar_mean, scalar_std, *, target_width=512,
                   max_tile_rows=1024):
    """(x - mean) / std with mean/std broadcast over the last axis of x.

    x: (..., F); scalar_mean, scalar_std: (F,).
    """
    orig_shape = x.shape
    F = orig_shape[-1]
    M = 1
    for d in orig_shape[:-1]:
        M *= d

    dtype = x.dtype
    itemsize = dtype.itemsize
    # Sublane packing granule: 8 rows for 4-byte, 16 for 2-byte, 32 for 1-byte.
    sub = max(8, 32 // itemsize)

    # --- lane-fold factor: smallest k with (k*F) % 128 == 0, grown towards
    #     target_width while it still divides M (so the reshape stays free).
    k_min = 128 // math.gcd(F, 128)
    if M % k_min == 0:
        k = k_min
        while k * F < target_width and M % (2 * k) == 0:
            k *= 2
    else:
        # Fall back to the un-folded layout; legal because the block minor dim
        # equals the full array extent F (stores are lane-masked if F < 128).
        k = 1
    width = k * F
    rows = M // k

    # --- row-tile size: big enough to amortize per-step overhead, small enough
    #     for scoped VMEM, and split into >= 4 grid steps so v7x's 2 TCs both
    #     get work and the DMA pipeline stays overlapped.
    vmem_tile_bytes = 2 << 20
    rows_by_vmem = max(sub, (vmem_tile_bytes // (width * itemsize)) // sub * sub)
    min_steps = 4
    rows_by_split = max(sub, _round_up(_cdiv(rows, min_steps), sub))
    if rows <= sub:
        tile_m = max(rows, 1)            # single full-extent block
    else:
        tile_m = min(max_tile_rows, rows_by_vmem, rows_by_split)
    grid = (_cdiv(rows, tile_m),)        # last block may overhang; Pallas masks

    # --- hoist reciprocal + lane-tiling of the tiny (F,) parameters out of the
    #     hot path (done once in the wrapper).
    inv_std = (1.0 / scalar_std.astype(jnp.float32)).astype(dtype)
    mean = scalar_mean.astype(dtype)
    mean_w = jnp.tile(mean, (k,)).reshape(1, width)
    inv_std_w = jnp.tile(inv_std, (k,)).reshape(1, width)

    x2 = x.reshape(rows, width)          # contiguous row-major reshape (free)

    bytes_accessed = 2 * M * F * itemsize + 2 * width * itemsize
    out_w = pl.pallas_call(
        _scalar_kernel,
        out_shape=jax.ShapeDtypeStruct((rows, width), dtype),
        grid_spec=pltpu.PrefetchScalarGridSpec(
            num_scalar_prefetch=0,
            grid=grid,
            in_specs=[
                pl.BlockSpec((tile_m, width), lambda i: (i, 0)),
                pl.BlockSpec((1, width), lambda i: (0, 0)),   # resident param
                pl.BlockSpec((1, width), lambda i: (0, 0)),   # resident param
            ],
            out_specs=pl.BlockSpec((tile_m, width), lambda i: (i, 0)),
        ),
        compiler_params=pltpu.CompilerParams(
            dimension_semantics=("parallel",),
        ),
        cost_estimate=pl.CostEstimate(
            flops=2 * M * F,
            transcendentals=0,
            bytes_accessed=bytes_accessed,
        ),
    )(x2, mean_w, inv_std_w)

    return out_w.reshape(orig_shape)     # free reshape; no slice, no pad


if __name__ == "__main__":
    key = jax.random.PRNGKey(0)
    k_x, k_mean, k_std, k_x2 = jax.random.split(key, 4)

    # PANN's Scalar operates on (batch, channels, time, mel_bins) with
    # mel_bins=64. Deterministic synthetic parameters (no checkpoint).
    F = 64
    scalar_mean = jax.random.normal(k_mean, (F,), dtype=jnp.float32)
    scalar_std = jax.random.uniform(
        k_std, (F,), dtype=jnp.float32, minval=0.5, maxval=1.5
    )

    # Case 1: M = 2*1*99 = 198 (even) -> folded lane-dense path (width 128),
    # ragged last grid block exercised (no pad / slice anywhere).
    B, C, T = 2, 1, 99
    x = jax.random.normal(k_x, (B, C, T, F), dtype=jnp.float32)
    out = jax.block_until_ready(scalar_forward(x, scalar_mean, scalar_std))
    ref = (x - scalar_mean) / scalar_std
    assert out.shape == (B, C, T, F)
    assert jnp.allclose(out, ref, atol=1e-5, rtol=1e-5)

    # Case 2: M = 33 (odd) -> un-folded full-F-extent path with ragged last
    # block; still a single HBM read + write pass.
    B2, C2, T2 = 1, 1, 33
    x_odd = jax.random.normal(k_x2, (B2, C2, T2, F), dtype=jnp.float32)
    out_odd = jax.block_until_ready(scalar_forward(x_odd, scalar_mean, scalar_std))
    ref_odd = (x_odd - scalar_mean) / scalar_std
    assert out_odd.shape == (B2, C2, T2, F)
    assert jnp.allclose(out_odd, ref_odd, atol=1e-5, rtol=1e-5)

    print("KERNEL_OK")
</pallas_src>

<mosaic_0001>
module attributes {stable_mosaic.version = 11 : i64} {
  func.func @_scalar_kernel(%arg0: i32, %arg1: memref<32x128xf32, #tpu.memory_space<vmem>>, %arg2: memref<1x128xf32, #tpu.memory_space<vmem>>, %arg3: memref<1x128xf32, #tpu.memory_space<vmem>>, %arg4: memref<32x128xf32, #tpu.memory_space<vmem>>) attributes {dimension_semantics = [#tpu.dimension_semantics<parallel>], iteration_bounds = array<i64: 4>, scalar_prefetch = 0 : i64, scratch_operands = 0 : i64, tpu.core_type = #tpu.core_type<tc>, window_params = [{transform_indices = @transform_0, window_bounds = array<i64: 32, 128>}, {pipeline_mode = #tpu.pipeline_mode<synchronous>, transform_indices = @transform_1, window_bounds = array<i64: 1, 128>}, {pipeline_mode = #tpu.pipeline_mode<synchronous>, transform_indices = @transform_2, window_bounds = array<i64: 1, 128>}, {transform_indices = @transform_3, window_bounds = array<i64: 32, 128>}]} {
    %c0 = arith.constant 0 : index
    %c0_0 = arith.constant 0 : index
    %0 = vector.load %arg1[%c0, %c0_0] : memref<32x128xf32, #tpu.memory_space<vmem>>, vector<32x128xf32>
    %c0_1 = arith.constant 0 : index
    %c0_2 = arith.constant 0 : index
    %1 = vector.load %arg2[%c0_1, %c0_2] : memref<1x128xf32, #tpu.memory_space<vmem>>, vector<1x128xf32>
    %2 = vector.broadcast %1 : vector<1x128xf32> to vector<32x128xf32>
    %3 = arith.subf %0, %2 : vector<32x128xf32>
    %c0_3 = arith.constant 0 : index
    %c0_4 = arith.constant 0 : index
    %4 = vector.load %arg3[%c0_3, %c0_4] : memref<1x128xf32, #tpu.memory_space<vmem>>, vector<1x128xf32>
    %5 = vector.broadcast %4 : vector<1x128xf32> to vector<32x128xf32>
    %6 = arith.mulf %3, %5 : vector<32x128xf32>
    %c0_5 = arith.constant 0 : index
    %c0_6 = arith.constant 0 : index
    %7 = vector.load %arg4[%c0_5, %c0_6] : memref<32x128xf32, #tpu.memory_space<vmem>>, vector<32x128xf32>
    tpu.vector_store %arg4[%c0_5, %c0_6], %6 {strides = array<i32>} : memref<32x128xf32, #tpu.memory_space<vmem>>, vector<32x128xf32>,
    return
  }
  func.func @transform_0(%arg0: i32) -> (i32, i32) {
    %c0_i32 = arith.constant 0 : i32
    %c0_i32_0 = arith.constant 0 : i32
    return %arg0, %c0_i32 : i32, i32
  }
  func.func @transform_1(%arg0: i32) -> (i32, i32) {
    %c0_i32 = arith.constant 0 : i32
    %c0_i32_0 = arith.constant 0 : i32
    %c0_i32_1 = arith.constant 0 : i32
    return %c0_i32, %c0_i32_0 : i32, i32
  }
  func.func @transform_2(%arg0: i32) -> (i32, i32) {
    %c0_i32 = arith.constant 0 : i32
    %c0_i32_0 = arith.constant 0 : i32
    %c0_i32_1 = arith.constant 0 : i32
    return %c0_i32, %c0_i32_0 : i32, i32
  }
  func.func @transform_3(%arg0: i32) -> (i32, i32) {
    %c0_i32 = arith.constant 0 : i32
    %c0_i32_0 = arith.constant 0 : i32
    return %arg0, %c0_i32 : i32, i32
  }
}

</mosaic_0001>

<bundles_post_ra>
// kernel: tpu_custom_call.1
= control target key start
LH: loop header
LB: loop body
LE: loop exit
PB: predicated region body
PF: predicated region fallthrough
CT: control target
= control target key end

     0   :  { %8 = vsyncpa [#allocation3], 0  ;;  %s692_s0 = inlined_call_operand.hbm [shape: f32[99,128], index: 0, kind: input, shape index: {}]   ;;  %s693_s1 = inlined_call_operand.vmem [shape: f32[1,128], index: 1, kind: input, shape index: {}]   ;;  %s694_s2 = inlined_call_operand.vmem [shape: f32[1,128], index: 2, kind: input, shape index: {}]   ;;  %s695_s3 = inlined_call_operand.hbm [shape: f32[99,128], index: 3, kind: output, shape index: {}]  }
   0x1   :  { %10 = vsyncpa [#allocation3 + $0x1], 0 }
   0x2   :  { %11 = vsyncpa [#allocation4], 0 }
   0x3   :  { %13 = vsyncpa [#allocation4 + $0x1], 0  ;;  %s519_s12 = smov 0   ;;  %s521_s13 = smov 0  }
   0x4   :  { %s523_s14 = smov 0   ;;  %s525_s15 = smov 0  }
   0x5 LB: > { %s540_s16 = sadd.s32 4294967295, %s491_s15   ;;  %s328_s17 = sadd.s32 4294967294, %s491_s15   ;;  %s491_s15 = sphi %s525_s15, %s703_s15   ;;  %s487_s14 = sphi %s523_s14, %s702_s14   ;;  %s483_s13 = sphi %s521_s13, %s701_s13   ;;  %s479_s12 = sphi %s519_s12, %s700_s12  }
   0x6   : > { %s544_s18 = sadd.s32 1, %s491_s15   ;;  %s26_s19 = sadd.s32 1, %s487_s14 }
   0x7   : > { %s23_s20 = ssub.s32 %s491_s15, %s544_s18  ;;  %p33_p0 = scmp.ne.s32.totalorder %s487_s14, %s483_s13 }
   0x8   : > { %p24_p1 = scmp.eq.s32.totalorder %s23_s20, 0  ;;  %p34_p2 = scmp.eq.s32.totalorder %s491_s15, 0 }
   0x9   : > { %p39_p3 = scmp.ne.s32.totalorder %s483_s13, %s479_s12  ;;  %p40_p4 = scmp.eq.s32.totalorder %s540_s16, 0 }
   0xa   : > { %s556_s21 = scalar_select %p24_p1, %s487_s14, %s26_s19  }
   0xb   : > { %p35_p5 = por %p34_p2, %p33_p0  ;;  %p558_p6 = por %p40_p4, %p39_p3 }
   0xc   : > { %p105_p7 = scmp.eq.s32.totalorder %s540_s16, 3  ;;  %p111_p8 = scmp.eq.s32.totalorder %s328_s17, 3 }
   0xd   : > { %p330_p11 = scmp.ge.s32.totalorder %s491_s15, 4 }
   0xe   : > { %p563_p9 = por %p105_p7, %p33_p0  ;;  %p567_p10 = por %p111_p8, %p39_p3 }
   0xf   : > { %133 = sbr.rel (%p330_p11) target bundleno = 57 (0x39), region = 24 }
  0x10   : > { %s698_s24 = scalar_select %p567_p10, 1, 0 }
  0x16   : > { %136 = sbr.rel (!%p35_p5) target bundleno = 57 (0x39), region = 28  ;;  %s137_s25 = sand.u32 (%p35_p5), 1, %s487_s14  }
  0x17   : > { %s332_s26 = sshll.u32 (%p35_p5), %s491_s15, 2  ;;  %s331_s27 = sshll.u32 (%p35_p5), %s137_s25, 5 }
  0x18   : > { %s143_s28 = ssub.s32 (%p35_p5), 13, %s332_s26  ;;  %s577_s4 = scalar_lea.sflag (%p35_p5), [#allocation3], %s137_s25 }
  0x19   : > { %p144_p12 = scmp.lt.s32.totalorder (%p35_p5), %s143_s28, 4  ;;  %s141_s5 = scalar_lea.vmem (%p35_p5), [#allocation2], %s331_s27 }
  0x1d   : > { %s705_s28 = smov (!%p144_p12, %s143_s28), 4 }
  0x1e   : > { %s574_s29 = sshll.u32 %s705_s28, 7 }
  0x1f   : > { %s148_s30 = ssub.s32 512, %s574_s29 }
  0x20   : > { %149 = vsyncadd %s577_s4, %s148_s30  ;;  %p334_p13 = scmp.ne.s32.totalorder %s574_s29, 0  ;;  %s352_s6 = sshll.u32 %s491_s15, 9 }
  0x21   : > { %s585_s9 = scalar_lea.hbm %s692_s0, %s352_s6  ;;  %s154_s10 = sshll.u32 %s141_s5, 4  ;;  %s587_s10 = int_to_ptr.vmem [resolvable:$true] %s154_s10 }
  0x22   : > { %s397_s11 = scalar_lea.hbm %s585_s9, %s574_s29  ;;  %s401_s20 = scalar_lea.hbm %s692_s0, 1664 }
  0x23   : > { %p398_p0 = scmp.ne.s32.totalorder %s585_s9, %s397_s11  ;;  %p402_p3 = scmp.lt.u32.totalorder %s585_s9, %s692_s0 }
  0x24   : > { %p403_p4 = scmp.lt.u32.totalorder %s401_s20, %s397_s11  ;;  %p405_p7 = scmp.lt.u32.totalorder %s397_s11, %s585_s9 }
  0x25   : > { %p399_p1 = pnand %p398_p0, %p334_p13 }
  0x26   : > { %p404_p5 = por %p403_p4, %p402_p3 }
  0x27   : > { %p400_p2 = pneg %p399_p1 }
  0x28   : > { %p406_p8 = por %p405_p7, %p404_p5 }
  0x2a   : > { %p407_p11 = pnand %p406_p8, %p400_p2 }
  0x2c   : > { %410 = shalt.err (!%p407_p11)
}
  0x2d   : > { %s411_s27 = scalar_lea.vmem %s587_s10, %s574_s29  ;;  %s493_s28 = smov [#allocation2]  }
  0x2e   : > { %p412_p12 = scmp.ne.s32.totalorder %s587_s10, %s411_s27  ;;  %s415_s30 = sshll.u32 %s493_s28, 4  ;;  %s416_s30 = int_to_ptr.vmem [resolvable:$false] %s415_s30 }
  0x2f   : > { %s417_s5 = scalar_lea.vmem %s416_s30, 1024  ;;  %p418_p10 = scmp.lt.s32.totalorder %s587_s10, %s416_s30 }
  0x30   : > { %p413_p0 = pnand %p412_p12, %p334_p13  ;;  %p419_p3 = scmp.lt.s32.totalorder %s417_s5, %s411_s27 }
  0x32   : > { %p414_p1 = pneg %p413_p0  ;;  %p420_p4 = por %p419_p3, %p418_p10 }
  0x34   : > { %p421_p5 = pnand %p420_p4, %p414_p1 }
  0x36   : > { %424 = shalt.err (!%p421_p5)
}
  0x37   : > { %s494_s6 = smov 128   ;;  %s495_s7 = smov 8  }
  0x38   : > { %160 = dma.hbm_to_vmem [thread:$0]  (%p334_p13), %s585_s9, %s574_s29, %s587_s10, %s577_s4, %s494_s6, %s494_s6, %s495_s7  }
  0x39 PF: > { %p338_p2 = scmp.ge.s32.totalorder %s491_s15, 1  ;;  %p162_p7 = scmp.lt.s32.totalorder %s491_s15, 5 }
  0x3b   : > { %p163_p8 = pnand %p338_p2, %p162_p7 }
  0x3c   : > { %s617_s8 = sand.u32 (!%p163_p8), 1, %s483_s13  }
  0x3d   : > { %166 = sbr.rel (%p163_p8) target bundleno = 105 (0x69), region = 32  ;;  %s339_s11 = sshll.u32 (!%p163_p8), %s617_s8, 5 }
  0x3e   : > { %s169_s17 = scalar_lea.sflag (!%p163_p8), [#allocation3], %s617_s8  ;;  %s172_s19 = scalar_lea.vmem (!%p163_p8), [#allocation2], %s339_s11 }
  0x44   : > { %470 = dma.done.wait (%p558_p6), %s169_s17, 512  }
  0x45   : > { %472 = vsyncadd (%p558_p6), %s169_s17, 4294966784  ;;  %v205_v0 = vld [vmem:[%s172_s19] sm:$0xff]  ;;  %v206_v4 = vld [vmem:[%s172_s19 + $0x8] sm:$0xff]  ;;  %s194_s22 = scalar_lea.vmem [#allocation5], %s339_s11  ;;  %s236_s20 = scalar_lea.sflag [#allocation4], %s617_s8 }
  0x46   : > { %v341_v1 = vld [vmem:[%s693_s1] ss:$0 sm:$0xff]  ;;  %v207_v5 = vld [vmem:[%s172_s19 + $0x10] sm:$0xff]  ;;  %v208_v6 = vld [vmem:[%s172_s19 + $0x18] sm:$0xff]  ;;  %242 = sbr.rel (!%p563_p9) target bundleno = 105 (0x69), region = 40  ;;  %s344_s25 = sshll.u32 (%p563_p9), %s540_s16, 2 }
  0x47   : > { %v342_v2 = vld [vmem:[%s694_s2] ss:$0 sm:$0xff]  ;;  %v216_v3 = vsub.f32 %v205_v0, %v341_v1  ;;  %v217_v7 = vsub.f32 %v206_v4, %v341_v1  ;;  %v218_v8 = vsub.f32 %v207_v5, %v341_v1  ;;  %v219_v9 = vsub.f32 %v208_v6, %v341_v1  ;;  %s244_s26 = ssub.s32 (%p563_p9), 13, %s344_s25 }
  0x48   : > { %p245_p6 = scmp.lt.s32.totalorder (%p563_p9), %s244_s26, 4 }
  0x49   : > { %v227_v10 = vmul.f32 %v342_v2, %v216_v3  ;;  %v228_v11 = vmul.f32 %v342_v2, %v217_v7  ;;  %v229_v12 = vmul.f32 %v342_v2, %v218_v8  ;;  %v230_v13 = vmul.f32 %v342_v2, %v219_v9 }
  0x4b   : > { %231 = vst [vmem:[%s194_s22] sm:$0xff] %v227_v10  ;;  %232 = vst [vmem:[%s194_s22 + $0x8] sm:$0xff] %v228_v11 }
  0x4c   : > { %233 = vst [vmem:[%s194_s22 + $0x10] sm:$0xff] %v229_v12  ;;  %234 = vst [vmem:[%s194_s22 + $0x18] sm:$0xff] %v230_v13 }
  0x4d   : > { %s707_s26 = smov (!%p245_p6, %s244_s26), 4 }
  0x4e   : > { %s635_s27 = sshll.u32 %s707_s26, 7 }
  0x4f   : > { %s249_s28 = ssub.s32 512, %s635_s27 }
  0x50   : > { %250 = vsyncadd %s236_s20, %s249_s28  ;;  %p346_p10 = scmp.ne.s32.totalorder %s635_s27, 0  ;;  %s353_s30 = sshll.u32 %s540_s16, 9 }
  0x51   : > { %s645_s6 = scalar_lea.hbm %s695_s3, %s353_s30  ;;  %s255_s7 = sshll.u32 %s194_s22, 4  ;;  %s647_s7 = int_to_ptr.vmem [resolvable:$true] %s255_s7 }
  0x52   : > { %s425_s11 = scalar_lea.vmem %s647_s7, %s635_s27  ;;  %s496_s17 = smov [#allocation5]  }
  0x53   : > { %p426_p9 = scmp.ne.s32.totalorder %s647_s7, %s425_s11  ;;  %s429_s19 = sshll.u32 %s496_s17, 4  ;;  %s430_s19 = int_to_ptr.vmem [resolvable:$false] %s429_s19 }
  0x54   : > { %s431_s16 = scalar_lea.vmem %s430_s19, 1024  ;;  %p432_p12 = scmp.lt.s32.totalorder %s647_s7, %s430_s19 }
  0x55   : > { %p427_p13 = pnand %p426_p9, %p346_p10  ;;  %p433_p0 = scmp.lt.s32.totalorder %s431_s16, %s425_s11 }
  0x57   : > { %p428_p11 = pneg %p427_p13  ;;  %p434_p1 = por %p433_p0, %p432_p12 }
  0x59   : > { %p435_p3 = pnand %p434_p1, %p428_p11 }
  0x5b   : > { %438 = shalt.err (!%p435_p3)
}
  0x5c   : > { %s439_s29 = scalar_lea.hbm %s645_s6, %s635_s27  ;;  %s443_s10 = scalar_lea.hbm %s695_s3, 1664 }
  0x5d   : > { %p440_p4 = scmp.ne.s32.totalorder %s645_s6, %s439_s29  ;;  %p444_p7 = scmp.lt.u32.totalorder %s645_s6, %s695_s3 }
  0x5e   : > { %p445_p8 = scmp.lt.u32.totalorder %s443_s10, %s439_s29  ;;  %p447_p9 = scmp.lt.u32.totalorder %s439_s29, %s645_s6 }
  0x5f   : > { %p441_p5 = pnand %p440_p4, %p346_p10 }
  0x60   : > { %p446_p6 = por %p445_p8, %p444_p7 }
  0x61   : > { %p442_p2 = pneg %p441_p5 }
  0x62   : > { %p448_p13 = por %p447_p9, %p446_p6 }
  0x64   : > { %p449_p11 = pnand %p448_p13, %p442_p2 }
  0x66   : > { %452 = shalt.err (!%p449_p11)
}
  0x67   : > { %s497_s26 = smov 128   ;;  %s498_s28 = smov 8  }
  0x68   : > { %261 = dma.vmem_to_hbm [thread:$0]  (%p346_p10), %s647_s7, %s635_s27, %s645_s6, %s236_s20, %s497_s26, %s497_s26, %s498_s28  }
  0x69 PF: > { %p360_p12 = scmp.ge.s32.totalorder %s491_s15, 2  ;;  %s270_s30 = sand.u32 1, %s479_s12  }
  0x6a   : > { %p699_p0 = scmp.ne.s32.totalorder %s698_s24, 0  ;;  %s271_s23 = scalar_lea.sflag [#allocation4], %s270_s30 }
  0x6c   : > { %p357_p1 = pnand %p360_p12, %p699_p0 }
  0x6e   : > { %474 = dma.done.wait (!%p357_p1), %s271_s23, 512  }
  0x6f   : > { %476 = vsyncadd (!%p357_p1), %s271_s23, 4294966784  ;;  %p16_p3 = scmp.ge.s32.totalorder %s544_s18, 6   ;;  %s700_s12 = smov %s483_s13 }
  0x70   : > { %s701_s13 = smov %s487_s14  ;;  %s702_s14 = smov %s556_s21 }
  0x71   : > { %s703_s15 = smov %s544_s18  ;;  %18 = sbr.rel (!%p16_p3) target bundleno = 5 (0x5), region = 77 }
  0x78   :  { %276 = vsyncpa [#allocation3], 1 }
  0x79   :  { %278 = vsyncpa [#allocation3 + $0x1], 1 }
  0x7a   :  { %279 = vsyncpa [#allocation4], 1 }
  0x7b   :  { %281 = vsyncpa [#allocation4 + $0x1], 1 }

</bundles_post_ra>
